<compile_context>
chip_gen: v7x
topology: tpu7x:2x2x1
jax: 0.10.0
libtpu: 0.0.40
codegen_flags: <defaults>
</compile_context>

<pallas_src>
import jax
import jax.numpy as jnp
from jax.experimental import pallas as pl
from jax.experimental.pallas import tpu as pltpu

_LANES = 128
_SUBLANES = 8
# ~2 MiB of DMA per input per grid step (scaled by dtype itemsize).
_TILE_BYTES_PER_INPUT = 2 * 1024 * 1024
# Fold-chunk / accumulator height: (64,128) f32 = 8 vregs; the loop body keeps
# well under the 64-vreg file so no spill traffic steals DMA slack.
_ACC_ROWS = 64


def _cdiv(a: int, b: int) -> int:
    return (a + b - 1) // b


def _round_up(x: int, m: int) -> int:
    return _cdiv(x, m) * m


def _make_kernel(tile_rows: int, acc_rows: int, steps_per_split: int,
                 rows_total: int):
    fold = tile_rows // acc_rows

    def kernel(t_ref, x_ref, o_ref):
        split = pl.program_id(0)
        step = pl.program_id(1)

        @pl.when(step == 0)
        def _init():
            o_ref[...] = jnp.zeros_like(o_ref)

        # Rows whose global index >= rows_total are grid overhang past the
        # true array extent (stale VMEM) and must be masked out.
        tile_row0 = (split * steps_per_split + step) * tile_rows
        limit = rows_total - tile_row0  # first invalid local row in this tile

        # Hoisted out of the loop (JAX does not CSE broadcast_in_dim).
        row_iota = jax.lax.broadcasted_iota(jnp.int32, (acc_rows, _LANES), 0)

        def body(c, acc):
            r0 = pl.multiple_of(c * acc_rows, acc_rows)
            t = t_ref[pl.ds(r0, acc_rows), :].astype(jnp.float32)
            x = x_ref[pl.ds(r0, acc_rows), :].astype(jnp.float32)
            # Exact reciprocal: full f32 accuracy; refinement hides under DMA.
            frac = (t - x) * pl.reciprocal(t, approx=False)
            # SELECT (not multiply-by-mask): overhang rows may hold zero
            # divisors -> inf/nan in frac, which the select simply drops.
            valid = row_iota < (limit - r0)
            return acc + jnp.where(valid, frac, 0.0)

        acc = jax.lax.fori_loop(
            0, fold, body,
            jnp.zeros((acc_rows, _LANES), jnp.float32),
            unroll=2 if fold >= 2 else 1)
        o_ref[...] += acc

    return kernel


def stdp_fractional_loss(inp: jax.Array, target: jax.Array) -> jax.Array:
    """Pallas equivalent of STDPFractionalLoss.forward(input, target)."""
    assert inp.shape == target.shape, (inp.shape, target.shape)
    n = inp.size
    assert n > 0

    x = inp.reshape(-1)
    t = target.reshape(-1)

    # Physical layout needs whole 128-lane rows.  Pad at most 127 elements
    # with 1.0 so they contribute (1-1)/1 == 0 exactly; when n % 128 == 0
    # (common case) this is a free metadata reshape, no copy.
    n_pad = _round_up(n, _LANES)
    if n_pad != n:
        pad = n_pad - n
        x = jnp.pad(x, (0, pad), constant_values=1)
        t = jnp.pad(t, (0, pad), constant_values=1)

    rows_total = n_pad // _LANES
    x2 = x.reshape(rows_total, _LANES)
    t2 = t.reshape(rows_total, _LANES)

    # Tile sizing: ~2 MiB of DMA per input per step, scaled by itemsize so
    # narrow dtypes (bf16/int8) keep the same bytes-per-step.
    itemsize = max(inp.dtype.itemsize, target.dtype.itemsize)
    max_tile_rows = max(
        _SUBLANES,
        (_TILE_BYTES_PER_INPUT // (_LANES * itemsize)) // _SUBLANES * _SUBLANES)

    if rows_total >= _SUBLANES:
        # Tile never exceeds the array extent; only the last tile overhangs.
        tile_rows = min(max_tile_rows, rows_total // _SUBLANES * _SUBLANES)
        acc_rows = min(_ACC_ROWS, tile_rows)
        tile_rows = tile_rows // acc_rows * acc_rows
    else:
        # Tiny input: a single block equal to the full row count.
        tile_rows = rows_total
        acc_rows = rows_total

    total_tiles = _cdiv(rows_total, tile_rows)
    # 2-way split of the stream so a 2-TensorCore chip (v7x) can shard the
    # "parallel" axis; no-op on single-TC v5e/v6e.  Only taken when it divides
    # evenly so no block ever starts fully out of bounds.
    num_splits = 2 if (total_tiles >= 2 and total_tiles % 2 == 0) else 1
    steps_per_split = total_tiles // num_splits

    in_map = lambda p, i: (p * steps_per_split + i, 0)
    out_map = lambda p, i: (p, 0)

    out_rows = num_splits * acc_rows
    partials = pl.pallas_call(
        _make_kernel(tile_rows, acc_rows, steps_per_split, rows_total),
        out_shape=jax.ShapeDtypeStruct((out_rows, _LANES), jnp.float32),
        grid_spec=pltpu.PrefetchScalarGridSpec(
            num_scalar_prefetch=0,
            grid=(num_splits, steps_per_split),
            in_specs=[
                pl.BlockSpec((tile_rows, _LANES), in_map),
                pl.BlockSpec((tile_rows, _LANES), in_map),
            ],
            out_specs=pl.BlockSpec((acc_rows, _LANES), out_map),
        ),
        compiler_params=pltpu.CompilerParams(
            dimension_semantics=("parallel", "arbitrary"),
            # Above v5e's 16 MiB default; 2 inputs x 2 MiB x 2 buffers = 8 MiB.
            vmem_limit_bytes=32 * 1024 * 1024,
        ),
        cost_estimate=pl.CostEstimate(
            flops=3 * n,
            transcendentals=n,
            bytes_accessed=n * (inp.dtype.itemsize + target.dtype.itemsize)
            + out_rows * _LANES * 4,
        ),
    )(t2, x2)

    # Tiny lane-dense partial-sum finish + mean in the wrapper.
    return jnp.sum(partials, dtype=jnp.float32) / n


if __name__ == "__main__":
    key = jax.random.PRNGKey(0)
    k1, k2, k3, k4, k5, k6 = jax.random.split(key, 6)

    # 1) Small aligned NCHW-shaped "dw" tensors (n % 128 == 0 -> zero padding).
    shape = (2, 4, 16, 16)
    # target = dw_in: kept away from zero (it is the divisor).
    target = jax.random.uniform(k1, shape, jnp.float32, minval=0.5, maxval=3.0)
    inp = jax.random.uniform(k2, shape, jnp.float32, minval=0.0, maxval=3.0)
    loss = jax.block_until_ready(stdp_fractional_loss(inp, target))
    ref = jnp.mean((target - inp) / target)
    assert jnp.allclose(loss, ref, rtol=1e-5, atol=1e-6), (loss, ref)

    # 2) Ragged size (n % 128 != 0): exercises the tiny lane-pad path.
    shape2 = (2, 3, 5, 7)
    target2 = jax.random.uniform(k3, shape2, jnp.float32, minval=0.5, maxval=3.0)
    inp2 = jax.random.uniform(k4, shape2, jnp.float32, minval=0.0, maxval=3.0)
    loss2 = jax.block_until_ready(stdp_fractional_loss(inp2, target2))
    ref2 = jnp.mean((target2 - inp2) / target2)
    assert jnp.allclose(loss2, ref2, rtol=1e-5, atol=1e-6), (loss2, ref2)

    # 3) Larger ragged size: multi-tile grid, 2-way split, masked overhang tile.
    shape3 = (4, 8, 33, 97)
    target3 = jax.random.uniform(k5, shape3, jnp.float32, minval=0.5, maxval=3.0)
    inp3 = jax.random.uniform(k6, shape3, jnp.float32, minval=0.0, maxval=3.0)
    loss3 = jax.block_until_ready(stdp_fractional_loss(inp3, target3))
    ref3 = jnp.mean((target3 - inp3) / target3)
    assert jnp.allclose(loss3, ref3, rtol=1e-5, atol=1e-6), (loss3, ref3)

    print("KERNEL_OK")
</pallas_src>

<mosaic_0001>
module attributes {stable_mosaic.version = 11 : i64} {
  func.func @kernel(%arg0: i32, %arg1: i32, %arg2: memref<16x128xf32, #tpu.memory_space<vmem>>, %arg3: memref<16x128xf32, #tpu.memory_space<vmem>>, %arg4: memref<16x128xf32, #tpu.memory_space<vmem>>) attributes {dimension_semantics = [#tpu.dimension_semantics<parallel>, #tpu.dimension_semantics<arbitrary>], iteration_bounds = array<i64: 1, 1>, scalar_prefetch = 0 : i64, scratch_operands = 0 : i64, tpu.core_type = #tpu.core_type<tc>, window_params = [{transform_indices = @transform_0, window_bounds = array<i64: 16, 128>}, {transform_indices = @transform_1, window_bounds = array<i64: 16, 128>}, {transform_indices = @transform_2, window_bounds = array<i64: 16, 128>}]} {
    %c0_i32 = arith.constant 0 : i32
    %0 = arith.cmpi eq, %arg1, %c0_i32 : i32
    %1 = arith.extui %0 : i1 to i32
    %c0_i32_0 = arith.constant 0 : i32
    %2 = arith.cmpi ne, %1, %c0_i32_0 : i32
    scf.if %2 {
      %cst_11 = arith.constant 0.000000e+00 : f32
      %27 = vector.broadcast %cst_11 : f32 to vector<16x128xf32>
      %c0_12 = arith.constant 0 : index
      %c0_13 = arith.constant 0 : index
      %28 = vector.load %arg4[%c0_12, %c0_13] : memref<16x128xf32, #tpu.memory_space<vmem>>, vector<16x128xf32>
      tpu.vector_store %arg4[%c0_12, %c0_13], %27 {strides = array<i32>} : memref<16x128xf32, #tpu.memory_space<vmem>>, vector<16x128xf32>,
    } else {
    }
    %c1_i32 = arith.constant 1 : i32
    %3 = arith.muli %arg0, %c1_i32 : i32
    %4 = arith.addi %3, %arg1 : i32
    %c16_i32 = arith.constant 16 : i32
    %5 = arith.muli %4, %c16_i32 : i32
    %c16_i32_1 = arith.constant 16 : i32
    %6 = arith.subi %c16_i32_1, %5 : i32
    %7 = tpu.iota {dimensions = array<i32: 0>} : vector<16x128xi32>
    %cst = arith.constant 0.000000e+00 : f32
    %8 = vector.broadcast %cst : f32 to vector<16x128xf32>
    %c0_i32_2 = arith.constant 0 : i32
    %c16_i32_3 = arith.constant 16 : i32
    %9 = arith.muli %c0_i32_2, %c16_i32_3 : i32
    %10 = tpu.assume_multiple %9, 16 : i32
    %11 = arith.index_cast %10 : i32 to index
    %c0 = arith.constant 0 : index
    %12 = vector.load %arg2[%11, %c0] : memref<16x128xf32, #tpu.memory_space<vmem>>, vector<16x128xf32>
    %13 = arith.index_cast %10 : i32 to index
    %c0_4 = arith.constant 0 : index
    %14 = vector.load %arg3[%13, %c0_4] : memref<16x128xf32, #tpu.memory_space<vmem>>, vector<16x128xf32>
    %15 = arith.subf %12, %14 : vector<16x128xf32>
    %16 = tpu.reciprocal %12 : vector<16x128xf32> -> vector<16x128xf32>
    %17 = arith.mulf %15, %16 : vector<16x128xf32>
    %18 = arith.subi %6, %10 : i32
    %19 = vector.broadcast %18 : i32 to vector<16x128xi32>
    %20 = arith.cmpi slt, %7, %19 : vector<16x128xi32>
    %cst_5 = arith.constant 0.000000e+00 : f32
    %21 = vector.broadcast %cst_5 : f32 to vector<16x128xf32>
    %22 = arith.select %20, %17, %21 : vector<16x128xi1>, vector<16x128xf32>
    %23 = arith.addf %8, %22 : vector<16x128xf32>
    %c1_i32_6 = arith.constant 1 : i32
    %c0_7 = arith.constant 0 : index
    %c0_8 = arith.constant 0 : index
    %24 = vector.load %arg4[%c0_7, %c0_8] : memref<16x128xf32, #tpu.memory_space<vmem>>, vector<16x128xf32>
    %25 = arith.addf %24, %23 : vector<16x128xf32>
    %c0_9 = arith.constant 0 : index
    %c0_10 = arith.constant 0 : index
    %26 = vector.load %arg4[%c0_9, %c0_10] : memref<16x128xf32, #tpu.memory_space<vmem>>, vector<16x128xf32>
    tpu.vector_store %arg4[%c0_9, %c0_10], %25 {strides = array<i32>} : memref<16x128xf32, #tpu.memory_space<vmem>>, vector<16x128xf32>,
    return
  }
  func.func @transform_0(%arg0: i32, %arg1: i32) -> (i32, i32) {
    %c1_i32 = arith.constant 1 : i32
    %0 = arith.muli %arg0, %c1_i32 : i32
    %1 = arith.addi %0, %arg1 : i32
    %c0_i32 = arith.constant 0 : i32
    %c0_i32_0 = arith.constant 0 : i32
    return %1, %c0_i32 : i32, i32
  }
  func.func @transform_1(%arg0: i32, %arg1: i32) -> (i32, i32) {
    %c1_i32 = arith.constant 1 : i32
    %0 = arith.muli %arg0, %c1_i32 : i32
    %1 = arith.addi %0, %arg1 : i32
    %c0_i32 = arith.constant 0 : i32
    %c0_i32_0 = arith.constant 0 : i32
    return %1, %c0_i32 : i32, i32
  }
  func.func @transform_2(%arg0: i32, %arg1: i32) -> (i32, i32) {
    %c0_i32 = arith.constant 0 : i32
    %c0_i32_0 = arith.constant 0 : i32
    return %arg0, %c0_i32 : i32, i32
  }
}

</mosaic_0001>

<bundles_post_ra>
// kernel: tpu_custom_call.1
= control target key start
LH: loop header
LB: loop body
LE: loop exit
PB: predicated region body
PF: predicated region fallthrough
CT: control target
= control target key end

     0   :  { %7 = vsyncpa [#allocation3], 0  ;;  %s253_s0 = inlined_call_operand.hbm [shape: f32[16,128], index: 0, kind: input, shape index: {}]   ;;  %s254_s1 = inlined_call_operand.hbm [shape: f32[16,128], index: 1, kind: input, shape index: {}]   ;;  %s255_s2 = inlined_call_operand.hbm [shape: f32[16,128], index: 2, kind: output, shape index: {}]  }
   0x1   :  { %8 = vsyncpa [#allocation6], 0 }
   0x2   :  { %9 = vsyncpa [#allocation4], 0  ;;  %s188_s9 = smov [#allocation2]   ;;  %s116_s13 = scalar_lea.hbm %s253_s0, 256 }
   0x3   :  { %s19_s10 = sshll.u32 %s188_s9, 4  ;;  %p117_p0 = scmp.ne.s32.totalorder %s253_s0, %s116_s13  ;;  %s20_s10 = int_to_ptr.vmem [resolvable:$true] %s19_s10 }
   0x4   :  { %p120_p1 = scmp.lt.u32.totalorder %s116_s13, %s253_s0 }
   0x6   :  { %p122_p2 = pnand %p120_p1, %p117_p0 }
   0x8   :  { %125 = shalt.err (!%p122_p2)
}
   0x9   :  { %s126_s18 = scalar_lea.vmem %s20_s10, 256  ;;  %p131_p4 = scmp.lt.s32.totalorder %s20_s10, %s20_s10 }
   0xa   :  { %p127_p3 = scmp.ne.s32.totalorder %s20_s10, %s126_s18  ;;  %p132_p5 = scmp.lt.s32.totalorder %s126_s18, %s126_s18 }
   0xc   :  { %p133_p6 = por %p132_p5, %p131_p4 }
   0xe   :  { %p134_p7 = pnand %p133_p6, %p127_p3 }
  0x10   :  { %137 = shalt.err (!%p134_p7)
}
  0x11   :  { %s189_s19 = smov 128   ;;  %s190_s20 = smov 8  }
  0x12   :  { %25 = dma.hbm_to_vmem [thread:$0]  %s253_s0, 256, %s20_s10, [#allocation3], %s189_s19, %s189_s19, %s190_s20  }
  0x13   :  { %s191_s23 = smov [#allocation5]   ;;  %s138_s27 = scalar_lea.hbm %s254_s1, 256 }
  0x14   :  { %s35_s24 = sshll.u32 %s191_s23, 4  ;;  %p139_p8 = scmp.ne.s32.totalorder %s254_s1, %s138_s27  ;;  %s36_s24 = int_to_ptr.vmem [resolvable:$true] %s35_s24 }
  0x15   :  { %p142_p9 = scmp.lt.u32.totalorder %s138_s27, %s254_s1 }
  0x17   :  { %p144_p10 = pnand %p142_p9, %p139_p8 }
  0x19   :  { %147 = shalt.err (!%p144_p10)
}
  0x1a   :  { %s148_s4 = scalar_lea.vmem %s36_s24, 256  ;;  %p153_p12 = scmp.lt.s32.totalorder %s36_s24, %s36_s24 }
  0x1b   :  { %p149_p11 = scmp.ne.s32.totalorder %s36_s24, %s148_s4  ;;  %p154_p13 = scmp.lt.s32.totalorder %s148_s4, %s148_s4 }
  0x1d   :  { %p155_p0 = por %p154_p13, %p153_p12 }
  0x1f   :  { %p156_p1 = pnand %p155_p0, %p149_p11 }
  0x21   :  { %159 = shalt.err (!%p156_p1)
}
  0x22   :  { %41 = dma.hbm_to_vmem [thread:$0]  %s254_s1, 256, %s36_s24, [#allocation6], %s189_s19, %s189_s19, %s190_s20  }
  0x23   :  { %182 = dma.done.wait [#allocation3], 256  }
  0x24   :  { %183 = vsyncadd [#allocation3], 4294967040 }
  0x25   :  { %184 = dma.done.wait [#allocation6], 256  }
  0x26   :  { %185 = vsyncadd [#allocation6], 4294967040  ;;  %v64_v0 = vld [vmem:[#allocation2] sm:$0xff]  ;;  %v65_v1 = vld [vmem:[#allocation2 + $0x8] sm:$0xff]  ;;  %s192_s6 = smov [#allocation7]  }
  0x27   :  { %112 = vrcp.f32 %v64_v0  ;;  %v66_v2 = vld [vmem:[#allocation5] sm:$0xff]  ;;  %v67_v3 = vld [vmem:[#allocation5 + $0x8] sm:$0xff]  ;;  %s93_s7 = sshll.u32 %s192_s6, 4  ;;  %s94_s7 = int_to_ptr.vmem [resolvable:$true] %s93_s7 }
  0x28   :  { %114 = vrcp.f32 %v65_v1  ;;  %v68_v4 = vsub.f32 %v64_v0, %v66_v2  ;;  %v69_v5 = vsub.f32 %v65_v1, %v67_v3  ;;  %s160_s1 = scalar_lea.vmem %s94_s7, 256  ;;  %p165_p3 = scmp.lt.s32.totalorder %s94_s7, %s94_s7 }
  0x29   :  { %p161_p2 = scmp.ne.s32.totalorder %s94_s7, %s160_s1  ;;  %p166_p4 = scmp.lt.s32.totalorder %s160_s1, %s160_s1 }
  0x2b   :  { %p167_p5 = por %p166_p4, %p165_p3 }
  0x2d   :  { %p168_p6 = pnand %p167_p5, %p161_p2 }
  0x31   :  { %v113_v6 = vpop.eup %112 }
  0x32   :  { %v115_v7 = vpop.eup %114  ;;  %v72_v8 = vmul.f32 %v113_v6, %v68_v4 }
  0x33   :  { %v73_v9 = vmul.f32 %v115_v7, %v69_v5 }
  0x34   :  { %86 = vst [vmem:[#allocation7] sm:$0xff] %v72_v8 }
  0x35   :  { %87 = vst [vmem:[#allocation7 + $0x8] sm:$0xff] %v73_v9 }
  0x36   :  { %171 = shalt.err (!%p168_p6)
}
  0x37   :  { %s172_s10 = scalar_lea.hbm %s255_s2, 256 }
  0x38   :  { %p173_p7 = scmp.ne.s32.totalorder %s255_s2, %s172_s10  ;;  %p176_p8 = scmp.lt.u32.totalorder %s172_s10, %s255_s2 }
  0x3a   :  { %p178_p9 = pnand %p176_p8, %p173_p7 }
  0x3c   :  { %181 = shalt.err (!%p178_p9)
}
  0x3d   :  { %99 = dma.vmem_to_hbm [thread:$0]  %s94_s7, 256, %s255_s2, [#allocation4], %s189_s19, %s189_s19, %s190_s20  }
  0x3e   :  { %186 = dma.done.wait [#allocation4], 256  }
  0x3f   :  { %187 = vsyncadd [#allocation4], 4294967040 }
  0x40   :  { %103 = vsyncpa [#allocation3], 1 }
  0x41   :  { %104 = vsyncpa [#allocation6], 1 }
  0x42   :  { %105 = vsyncpa [#allocation4], 1 }

</bundles_post_ra>
